<compile_context>
chip_gen: v7x
topology: tpu7x:2x2x1
jax: 0.10.0
libtpu: 0.0.40
codegen_flags: <defaults>
</compile_context>

<pallas_src>
import jax
import jax.numpy as jnp
from jax.experimental import pallas as pl
from jax.experimental.pallas import tpu as pltpu


# ----------------------------------------------------------------------------
# Pallas kernel: one fused matmul + bias per pixel tile
# ----------------------------------------------------------------------------

def _conv_meanpool_kernel(x_ref, w_ref, b_ref, o_ref):
    """out[co, n] = sum_r w[co, r] * x[r, n] + b[co]   (r = folded tap*Cin rows)

    x_ref : (R, TILE_N)    bf16  folded tap/channel rows, pooled pixels on lanes
    w_ref : (Cout, R)      bf16  pool-folded effective weights (resident)
    b_ref : (Cout, 1)      f32   conv bias (resident)
    o_ref : (Cout, TILE_N) f32   pooled output tile (lane-dense)
    """
    y = jnp.dot(w_ref[...], x_ref[...], preferred_element_type=jnp.float32)
    o_ref[...] = (y + b_ref[...]).astype(o_ref.dtype)


# ----------------------------------------------------------------------------
# Tiling helpers
# ----------------------------------------------------------------------------

def _round_up(x, m):
    return (x + m - 1) // m * m


def _pick_tile_n(n128):
    """Largest lane-aligned pixel tile dividing the 128-aligned pixel count."""
    for t in (8192, 4096, 2048, 1024, 512, 256, 128):
        if n128 % t == 0:
            return t
    return 128  # unreachable: n128 is a multiple of 128


# ----------------------------------------------------------------------------
# Wrapper: layout glue (pool-folded weights, per-tap strided views, padding)
# ----------------------------------------------------------------------------

def conv_mean_pool(x, weight, bias):
    """ConvMeanPool forward.

    x      : (B, Cin, H, W)    float32, NCHW (PyTorch layout)
    weight : (Cout, Cin, k, k) float32, PyTorch Conv2d weight layout
    bias   : (Cout,)           float32
    returns: (B, Cout, H//2, W//2) float32, NCHW
    """
    B, Cin, H, W = x.shape
    Cout, Cin_w, k, k_w = weight.shape
    assert Cin == Cin_w and k == k_w and k % 2 == 1
    assert H % 2 == 0 and W % 2 == 0, "2x2 mean-pool needs even spatial dims"

    pad = (k - 1) // 2
    Ho, Wo = H // 2, W // 2
    M = Ho * Wo                      # pooled pixels per image
    Keff = k + 1                     # pool-folded effective kernel size
    T = Keff * Keff                  # number of taps
    R = T * Cin                      # folded MXU contraction length

    # --- fold the 2x2 mean pool into an effective (k+1)x(k+1) stride-2 conv ---
    w_hw = jnp.transpose(weight, (2, 3, 0, 1)).astype(jnp.float32)   # (k,k,Cout,Cin)
    w_eff = jnp.zeros((Keff, Keff, Cout, Cin), jnp.float32)
    for dy in (0, 1):
        for dx in (0, 1):
            w_eff = w_eff.at[dy:dy + k, dx:dx + k].add(0.25 * w_hw)
    # (Keff,Keff,Cout,Cin) -> (Cout, T*Cin); row order = (tap major, ci minor)
    w2d = jnp.transpose(w_eff.reshape(T, Cout, Cin), (1, 0, 2)).reshape(Cout, R)
    w2d = w2d.astype(jnp.bfloat16)

    # --- per-tap strided views of the zero-padded bf16 input (layout glue) ----
    xp = jnp.pad(x.astype(jnp.bfloat16), ((0, 0), (0, 0), (pad, pad), (pad, pad)))
    taps = []
    for ey in range(Keff):
        for ex in range(Keff):
            v = xp[:, :, ey:ey + 2 * Ho:2, ex:ex + 2 * Wo:2]          # (B,Cin,Ho,Wo)
            taps.append(v.reshape(B, Cin, M))
    # (B, T, Cin, M): taps fold into the contraction rows, batch folds into the
    # pixel/lane axis -> (T*Cin, B*M), one long 'parallel' pixel axis.
    x2d = jnp.stack(taps, axis=1)                                     # (B,T,Cin,M)
    x2d = jnp.transpose(x2d, (1, 2, 0, 3)).reshape(R, B * M)          # (R, B*M)

    # --- lane-align the pixel axis (no masked stores, pipelinable tiles) ------
    N = B * M
    tile_n = _pick_tile_n(_round_up(N, 128))
    N_pad = _round_up(N, tile_n)
    if N_pad != N:
        x2d = jnp.pad(x2d, ((0, 0), (0, N_pad - N)))

    bias2d = bias.reshape(Cout, 1).astype(jnp.float32)

    out2d = pl.pallas_call(
        _conv_meanpool_kernel,
        out_shape=jax.ShapeDtypeStruct((Cout, N_pad), jnp.float32),
        grid_spec=pltpu.PrefetchScalarGridSpec(
            num_scalar_prefetch=0,
            grid=(N_pad // tile_n,),
            in_specs=[
                pl.BlockSpec((R, tile_n), lambda n: (0, n)),       # input tile
                pl.BlockSpec((Cout, R), lambda n: (0, 0)),         # resident weights
                pl.BlockSpec((Cout, 1), lambda n: (0, 0)),         # resident bias
            ],
            out_specs=pl.BlockSpec((Cout, tile_n), lambda n: (0, n)),
        ),
        compiler_params=pltpu.CompilerParams(
            dimension_semantics=("parallel",),
            vmem_limit_bytes=32 * 1024 * 1024,
        ),
    )(x2d, w2d, bias2d)

    out = out2d[:, :N].reshape(Cout, B, Ho, Wo)
    return jnp.transpose(out, (1, 0, 2, 3))


# ----------------------------------------------------------------------------
# Pure-JAX reference (for correctness verification only)
# ----------------------------------------------------------------------------

def conv_mean_pool_reference(x, weight, bias):
    k = weight.shape[-1]
    pad = (k - 1) // 2
    y = jax.lax.conv_general_dilated(
        x, weight, window_strides=(1, 1), padding=[(pad, pad), (pad, pad)],
        dimension_numbers=("NCHW", "OIHW", "NCHW"))
    y = y + bias.reshape(1, -1, 1, 1)
    return 0.25 * (y[:, :, ::2, ::2] + y[:, :, 1::2, ::2]
                   + y[:, :, ::2, 1::2] + y[:, :, 1::2, 1::2])


# ----------------------------------------------------------------------------
# Main
# ----------------------------------------------------------------------------

if __name__ == "__main__":
    B, CIN, H, W = 2, 4, 16, 16
    COUT, K = 8, 3

    key = jax.random.PRNGKey(0)
    kx, kw, kb = jax.random.split(key, 3)
    x = jax.random.normal(kx, (B, CIN, H, W), dtype=jnp.float32)
    weight = 0.1 * jax.random.normal(kw, (COUT, CIN, K, K), dtype=jnp.float32)
    bias = 0.1 * jax.random.normal(kb, (COUT,), dtype=jnp.float32)

    fwd = jax.jit(conv_mean_pool)
    out = jax.block_until_ready(fwd(x, weight, bias))

    assert out.shape == (B, COUT, H // 2, W // 2), out.shape
    assert out.dtype == jnp.float32
    assert bool(jnp.all(jnp.isfinite(out)))

    ref = conv_mean_pool_reference(x, weight, bias)
    max_err = float(jnp.max(jnp.abs(out - ref)))
    assert max_err < 5e-2, f"max abs error vs reference: {max_err}"

    print("KERNEL_OK")
</pallas_src>

<mosaic_0001>
module attributes {stable_mosaic.version = 11 : i64} {
  func.func @_conv_meanpool_kernel(%arg0: i32, %arg1: memref<64x128xbf16, #tpu.memory_space<vmem>>, %arg2: memref<8x64xbf16, #tpu.memory_space<vmem>>, %arg3: memref<8x1xf32, #tpu.memory_space<vmem>>, %arg4: memref<8x128xf32, #tpu.memory_space<vmem>>) attributes {dimension_semantics = [#tpu.dimension_semantics<parallel>], iteration_bounds = array<i64: 1>, scalar_prefetch = 0 : i64, scratch_operands = 0 : i64, tpu.core_type = #tpu.core_type<tc>, window_params = [{transform_indices = @transform_0, window_bounds = array<i64: 64, 128>}, {pipeline_mode = #tpu.pipeline_mode<synchronous>, transform_indices = @transform_1, window_bounds = array<i64: 8, 64>}, {pipeline_mode = #tpu.pipeline_mode<synchronous>, transform_indices = @transform_2, window_bounds = array<i64: 8, 1>}, {transform_indices = @transform_3, window_bounds = array<i64: 8, 128>}]} {
    %c0 = arith.constant 0 : index
    %c0_0 = arith.constant 0 : index
    %0 = vector.load %arg2[%c0, %c0_0] : memref<8x64xbf16, #tpu.memory_space<vmem>>, vector<8x64xbf16>
    %c0_1 = arith.constant 0 : index
    %c0_2 = arith.constant 0 : index
    %1 = vector.load %arg1[%c0_1, %c0_2] : memref<64x128xbf16, #tpu.memory_space<vmem>>, vector<64x128xbf16>
    %cst = arith.constant dense<0.000000e+00> : vector<8x128xf32>
    %2 = tpu.matmul %0, %1, %cst {dimension_numbers = #tpu.dot_dimension_numbers<[1], [0], [0], [1], [0, 0, 1, 1], [], []>} : vector<8x64xbf16>, vector<64x128xbf16>, vector<8x128xf32> -> vector<8x128xf32>
    %c0_3 = arith.constant 0 : index
    %c0_4 = arith.constant 0 : index
    %3 = vector.load %arg3[%c0_3, %c0_4] : memref<8x1xf32, #tpu.memory_space<vmem>>, vector<8x1xf32>
    %4 = vector.broadcast %3 : vector<8x1xf32> to vector<8x128xf32>
    %5 = arith.addf %2, %4 : vector<8x128xf32>
    %c0_5 = arith.constant 0 : index
    %c0_6 = arith.constant 0 : index
    %6 = vector.load %arg4[%c0_5, %c0_6] : memref<8x128xf32, #tpu.memory_space<vmem>>, vector<8x128xf32>
    tpu.vector_store %arg4[%c0_5, %c0_6], %5 {strides = array<i32>} : memref<8x128xf32, #tpu.memory_space<vmem>>, vector<8x128xf32>,
    return
  }
  func.func @transform_0(%arg0: i32) -> (i32, i32) {
    %c0_i32 = arith.constant 0 : i32
    %c0_i32_0 = arith.constant 0 : i32
    return %c0_i32, %arg0 : i32, i32
  }
  func.func @transform_1(%arg0: i32) -> (i32, i32) {
    %c0_i32 = arith.constant 0 : i32
    %c0_i32_0 = arith.constant 0 : i32
    %c0_i32_1 = arith.constant 0 : i32
    return %c0_i32, %c0_i32_0 : i32, i32
  }
  func.func @transform_2(%arg0: i32) -> (i32, i32) {
    %c0_i32 = arith.constant 0 : i32
    %c0_i32_0 = arith.constant 0 : i32
    %c0_i32_1 = arith.constant 0 : i32
    return %c0_i32, %c0_i32_0 : i32, i32
  }
  func.func @transform_3(%arg0: i32) -> (i32, i32) {
    %c0_i32 = arith.constant 0 : i32
    %c0_i32_0 = arith.constant 0 : i32
    return %c0_i32, %arg0 : i32, i32
  }
}

</mosaic_0001>

<bundles_post_ra>
// kernel: conv_mean_pool.1
= control target key start
LH: loop header
LB: loop body
LE: loop exit
PB: predicated region body
PF: predicated region fallthrough
CT: control target
= control target key end

     0   :  { %v133_v0 = vmov 0.0   ;;  %vm134_vm0 = vmmov 0   ;;  %v135_v2 = vmov 0   ;;  %vm54_vm1 = vcmask 523264   ;;  %s177_s0 = inlined_call_operand.vmem [shape: bf16[64,128], index: 0, kind: input, shape index: {}]   ;;  %s178_s2 = inlined_call_operand.vmem [shape: f32[8,1], index: 2, kind: input, shape index: {}]   ;;  %s179_s1 = inlined_call_operand.vmem [shape: bf16[8,64], index: 1, kind: input, shape index: {}]   ;;  %s180_s3 = inlined_call_operand.vmem [shape: f32[8,128], index: 3, kind: output, shape index: {}]  }
   0x1   :  { %113 = vmatprep.subr.bf16.mxu0 %v133_v0  ;;  %v129_v1 = vld [vmem:[%s177_s0] sm:$0xff]   ;;  %121 = vmatprep.mubr.msk.bf16.mxu0 %vm134_vm0, %v133_v0  ;;  %v130_v3 = vld [vmem:[%s177_s0 + $0x8] sm:$0xff]   ;;  %v131_v5 = vld [vmem:[%s177_s0 + $0x10] sm:$0xff]  }
   0x2   :  { %128 = vset.pattern.permute.xlu0 %v135_v2  ;;  %114 = vmatpush3.bf16.msra.mxu0 %v129_v1  ;;  %v24_v4 = vld [vmem:[%s178_s2] sm:$0xff]  ;;  %v132_v6 = vld [vmem:[%s177_s0 + $0x18] sm:$0xff]  }
   0x3   :  { %115 = vmatprep.subr.bf16.mxu0 %v133_v0  ;;  %27 = vperm.xlu0 %128, %v24_v4   ;;  %v15_v7 = vld [vmem:[%s179_s1] sm:$0xf] }
   0x6   :  { %116 = vmatpush3.bf16.msra.mxu0 %v130_v3 }
   0x7   :  { %117 = vmatprep.subr.bf16.mxu0 %v133_v0 }
   0xa   :  { %118 = vmatpush3.bf16.msra.mxu0 %v131_v5 }
   0xb   :  { %119 = vmatprep.subr.bf16.mxu0 %v133_v0 }
   0xe   :  { %120 = vmatpush3.bf16.msra.mxu0 %v132_v6 }
  0x11   :  { %122 = vmatmul.mubr.msk.bf16.vlgmr.msra.gmra.mrb[0].mxu0 %vm54_vm1, %v15_v7 }
  0x82   :  { %v28_v8 = vpop.permute.xlu0 %27 }
  0xe4   :  { %v92_v9 = vpop.f32.mrb[0].mxu0 }
  0xe5   :  { %v93_v10 = vadd.f32 %v92_v9, %v28_v8  ;;  %v123_v11 = vpop.f32.mrb[1].mxu0 }
  0xe6   :  { %v95_v12 = vpop.f32.mrb[2].mxu0 }
  0xe7   :  { %98 = vst [vmem:[%s180_s3] sm:$0xff] %v93_v10  ;;  %v124_v13 = vpop.f32.mrb[3].mxu0 }

</bundles_post_ra>
